<compile_context>
chip_gen: v6e
topology: v6e:2x2x1
jax: 0.10.0
libtpu: 0.0.40
codegen_flags: <defaults>
</compile_context>

<pallas_src>
from functools import partial

import jax
import jax.numpy as jnp
from jax.experimental import pallas as pl
from jax.experimental.pallas import tpu as pltpu

LANE = 128
SUBLANE = 8
DESIRED_TILE_ROWS = 2048   # 2048 x 128 f32 = 1 MiB per input block


def _round_up(x, m):
    return ((x + m - 1) // m) * m


def _focal_loss_kernel(p_ref, t_ref, out_ref, *, alpha, gamma, n_valid,
                       tile_r, blocks_per_core, needs_mask):
    c = pl.program_id(0)   # TensorCore shard ("parallel")
    i = pl.program_id(1)   # reduction step ("arbitrary")

    # out_ref is the per-core (8, 128) accumulator, resident across axis 1.
    @pl.when(i == 0)
    def _():
        out_ref[...] = jnp.zeros_like(out_ref)

    p = p_ref[...].astype(jnp.float32)
    t = t_ref[...].astype(jnp.float32)

    # F.binary_cross_entropy (probability path); PyTorch clamps log at -100.
    log_p = jnp.maximum(jnp.log(p), jnp.float32(-100.0))
    log_1mp = jnp.maximum(jnp.log(1.0 - p), jnp.float32(-100.0))
    bce = -(t * log_p + (1.0 - t) * log_1mp)

    pt = jnp.exp(-bce)
    one_minus_pt = 1.0 - pt
    if gamma == 2.0:                       # pow -> one VPU multiply
        focal_w = one_minus_pt * one_minus_pt
    elif gamma == 1.0:
        focal_w = one_minus_pt
    elif gamma == 0.0:
        focal_w = jnp.ones_like(one_minus_pt)
    else:
        focal_w = one_minus_pt ** jnp.float32(gamma)

    f_loss = focal_w * bce
    if alpha != 1.0:
        f_loss = jnp.float32(alpha) * f_loss

    if needs_mask:
        # Zero out elements past the true element count: lane/row padding,
        # ragged last block, or a clamped duplicate block on an uneven split.
        blk = c * blocks_per_core + i
        row0 = blk * tile_r
        row_ids = row0 + jax.lax.broadcasted_iota(jnp.int32, f_loss.shape, 0)
        lane_ids = jax.lax.broadcasted_iota(jnp.int32, f_loss.shape, 1)
        gidx = row_ids * LANE + lane_ids
        f_loss = jnp.where(gidx < n_valid, f_loss, jnp.float32(0.0))

    # Fold the (tile_r, 128) tile into the resident (8, 128) accumulator with
    # cheap vreg-wise VPU adds; the expensive cross-lane reduce happens once,
    # outside the kernel.
    out_ref[...] += f_loss.reshape(tile_r // SUBLANE, SUBLANE, LANE).sum(axis=0)


def focal_loss(inputs, targets, alpha=1.0, gamma=2.0):
    """Mean focal loss over all elements (logits=False, reduce=True path)."""
    n = inputs.size
    p = inputs.reshape(-1)
    t = targets.reshape(-1)

    # Lane-major 2-D view. Only pad (at most 8*128-1 elements) when the size is
    # not already a multiple of 8*128; pad values are masked in the kernel.
    rows = _round_up(pl.cdiv(n, LANE), SUBLANE)
    pad = rows * LANE - n
    if pad:
        p = jnp.pad(p, (0, pad))
        t = jnp.pad(t, (0, pad))
    p2 = p.reshape(rows, LANE)
    t2 = t.reshape(rows, LANE)

    tile_r = min(DESIRED_TILE_ROWS, rows)          # both multiples of 8
    blocks_total = pl.cdiv(rows, tile_r)

    # Shard the reduction over both TensorCores on v7x (serial loop elsewhere).
    num_cores = 2 if blocks_total >= 2 else 1
    blocks_per_core = pl.cdiv(blocks_total, num_cores)
    even_split = (num_cores * blocks_per_core == blocks_total)

    if even_split:
        def in_map(c, i):
            return (c * blocks_per_core + i, 0)
    else:
        def in_map(c, i):
            # Clamp duplicated trailing blocks; the kernel mask zeroes them.
            return (jnp.minimum(c * blocks_per_core + i, blocks_total - 1), 0)

    needs_mask = (pad != 0) or (not even_split) or (blocks_total * tile_r != rows)

    kernel = partial(
        _focal_loss_kernel, alpha=float(alpha), gamma=float(gamma),
        n_valid=n, tile_r=tile_r, blocks_per_core=blocks_per_core,
        needs_mask=needs_mask)

    partials = pl.pallas_call(
        kernel,
        out_shape=jax.ShapeDtypeStruct((num_cores * SUBLANE, LANE), jnp.float32),
        grid_spec=pltpu.PrefetchScalarGridSpec(
            num_scalar_prefetch=0,
            grid=(num_cores, blocks_per_core),
            in_specs=[
                pl.BlockSpec((tile_r, LANE), in_map),
                pl.BlockSpec((tile_r, LANE), in_map),
            ],
            out_specs=pl.BlockSpec((SUBLANE, LANE), lambda c, i: (c, 0)),
        ),
        compiler_params=pltpu.CompilerParams(
            dimension_semantics=("parallel", "arbitrary")),
    )(p2, t2)

    # Single tiny cross-lane reduction + mean normalization outside the kernel.
    return jnp.sum(partials) / jnp.float32(n)


def focal_loss_ref(inputs, targets, alpha=1.0, gamma=2.0):
    p = inputs.astype(jnp.float32)
    t = targets.astype(jnp.float32)
    log_p = jnp.maximum(jnp.log(p), -100.0)
    log_1mp = jnp.maximum(jnp.log(1.0 - p), -100.0)
    bce = -(t * log_p + (1.0 - t) * log_1mp)
    pt = jnp.exp(-bce)
    return jnp.mean(alpha * (1.0 - pt) ** gamma * bce)


if __name__ == "__main__":
    key = jax.random.PRNGKey(0)
    k1, k2 = jax.random.split(key)

    # inputs are probabilities (logits=False path), targets are binary labels
    x = jax.random.uniform(k1, (2, 4, 16, 16), jnp.float32,
                           minval=0.01, maxval=0.99)
    y = jax.random.bernoulli(k2, 0.5, (2, 4, 16, 16)).astype(jnp.float32)

    loss = jax.block_until_ready(focal_loss(x, y))
    ref = jax.block_until_ready(focal_loss_ref(x, y))
    assert jnp.allclose(loss, ref, rtol=1e-5, atol=1e-6), (loss, ref)

    print("KERNEL_OK")
</pallas_src>

<mosaic_0001>
module attributes {stable_mosaic.version = 11 : i64} {
  func.func @_focal_loss_kernel(%arg0: i32, %arg1: i32, %arg2: memref<16x128xf32, #tpu.memory_space<vmem>>, %arg3: memref<16x128xf32, #tpu.memory_space<vmem>>, %arg4: memref<8x128xf32, #tpu.memory_space<vmem>>) attributes {dimension_semantics = [#tpu.dimension_semantics<parallel>, #tpu.dimension_semantics<arbitrary>], iteration_bounds = array<i64: 1, 1>, scalar_prefetch = 0 : i64, scratch_operands = 0 : i64, tpu.core_type = #tpu.core_type<tc>, window_params = [{transform_indices = @transform_0, window_bounds = array<i64: 16, 128>}, {transform_indices = @transform_1, window_bounds = array<i64: 16, 128>}, {transform_indices = @transform_2, window_bounds = array<i64: 8, 128>}]} {
    %c0_i32 = arith.constant 0 : i32
    %0 = arith.cmpi eq, %arg1, %c0_i32 : i32
    %1 = arith.extui %0 : i1 to i32
    %c0_i32_0 = arith.constant 0 : i32
    %2 = arith.cmpi ne, %1, %c0_i32_0 : i32
    scf.if %2 {
      %cst_15 = arith.constant 0.000000e+00 : f32
      %32 = vector.broadcast %cst_15 : f32 to vector<8x128xf32>
      %c0_16 = arith.constant 0 : index
      %c0_17 = arith.constant 0 : index
      %33 = vector.load %arg4[%c0_16, %c0_17] : memref<8x128xf32, #tpu.memory_space<vmem>>, vector<8x128xf32>
      tpu.vector_store %arg4[%c0_16, %c0_17], %32 {strides = array<i32>} : memref<8x128xf32, #tpu.memory_space<vmem>>, vector<8x128xf32>,
    } else {
    }
    %c0 = arith.constant 0 : index
    %c0_1 = arith.constant 0 : index
    %3 = vector.load %arg2[%c0, %c0_1] : memref<16x128xf32, #tpu.memory_space<vmem>>, vector<16x128xf32>
    %c0_2 = arith.constant 0 : index
    %c0_3 = arith.constant 0 : index
    %4 = vector.load %arg3[%c0_2, %c0_3] : memref<16x128xf32, #tpu.memory_space<vmem>>, vector<16x128xf32>
    %5 = math.log %3 : vector<16x128xf32>
    %cst = arith.constant -1.000000e+02 : f32
    %6 = vector.broadcast %cst : f32 to vector<16x128xf32>
    %7 = arith.maximumf %5, %6 : vector<16x128xf32>
    %cst_4 = arith.constant 1.000000e+00 : f32
    %8 = vector.broadcast %cst_4 : f32 to vector<16x128xf32>
    %9 = arith.subf %8, %3 : vector<16x128xf32>
    %10 = math.log %9 : vector<16x128xf32>
    %cst_5 = arith.constant -1.000000e+02 : f32
    %11 = vector.broadcast %cst_5 : f32 to vector<16x128xf32>
    %12 = arith.maximumf %10, %11 : vector<16x128xf32>
    %13 = arith.mulf %4, %7 : vector<16x128xf32>
    %cst_6 = arith.constant 1.000000e+00 : f32
    %14 = vector.broadcast %cst_6 : f32 to vector<16x128xf32>
    %15 = arith.subf %14, %4 : vector<16x128xf32>
    %16 = arith.mulf %15, %12 : vector<16x128xf32>
    %17 = arith.addf %13, %16 : vector<16x128xf32>
    %cst_7 = arith.constant 0.000000e+00 : f32
    %18 = vector.broadcast %cst_7 : f32 to vector<16x128xf32>
    %19 = arith.subf %18, %17 : vector<16x128xf32>
    %cst_8 = arith.constant 0.000000e+00 : f32
    %20 = vector.broadcast %cst_8 : f32 to vector<16x128xf32>
    %21 = arith.subf %20, %19 : vector<16x128xf32>
    %22 = math.exp %21 : vector<16x128xf32>
    %cst_9 = arith.constant 1.000000e+00 : f32
    %23 = vector.broadcast %cst_9 : f32 to vector<16x128xf32>
    %24 = arith.subf %23, %22 : vector<16x128xf32>
    %25 = arith.mulf %24, %24 : vector<16x128xf32>
    %26 = arith.mulf %25, %19 : vector<16x128xf32>
    %c0_10 = arith.constant 0 : index
    %c0_11 = arith.constant 0 : index
    %27 = vector.load %arg4[%c0_10, %c0_11] : memref<8x128xf32, #tpu.memory_space<vmem>>, vector<8x128xf32>
    %28 = vector.shape_cast %26 : vector<16x128xf32> to vector<2x8x128xf32>
    %cst_12 = arith.constant dense<0.000000e+00> : vector<8x128xf32>
    %29 = vector.multi_reduction <add>, %28, %cst_12 [0] : vector<2x8x128xf32> to vector<8x128xf32>
    %30 = arith.addf %27, %29 : vector<8x128xf32>
    %c0_13 = arith.constant 0 : index
    %c0_14 = arith.constant 0 : index
    %31 = vector.load %arg4[%c0_13, %c0_14] : memref<8x128xf32, #tpu.memory_space<vmem>>, vector<8x128xf32>
    tpu.vector_store %arg4[%c0_13, %c0_14], %30 {strides = array<i32>} : memref<8x128xf32, #tpu.memory_space<vmem>>, vector<8x128xf32>,
    return
  }
  func.func @transform_0(%arg0: i32, %arg1: i32) -> (i32, i32) {
    %c1_i32 = arith.constant 1 : i32
    %0 = arith.muli %arg0, %c1_i32 : i32
    %1 = arith.addi %0, %arg1 : i32
    %c0_i32 = arith.constant 0 : i32
    %c0_i32_0 = arith.constant 0 : i32
    return %1, %c0_i32 : i32, i32
  }
  func.func @transform_1(%arg0: i32, %arg1: i32) -> (i32, i32) {
    %c1_i32 = arith.constant 1 : i32
    %0 = arith.muli %arg0, %c1_i32 : i32
    %1 = arith.addi %0, %arg1 : i32
    %c0_i32 = arith.constant 0 : i32
    %c0_i32_0 = arith.constant 0 : i32
    return %1, %c0_i32 : i32, i32
  }
  func.func @transform_2(%arg0: i32, %arg1: i32) -> (i32, i32) {
    %c0_i32 = arith.constant 0 : i32
    %c0_i32_0 = arith.constant 0 : i32
    return %arg0, %c0_i32 : i32, i32
  }
}

</mosaic_0001>

<bundles_post_ra>
// kernel: tpu_custom_call.1
= control target key start
LH: loop header
LB: loop body
LE: loop exit
PB: predicated region body
PF: predicated region fallthrough
CT: control target
= control target key end

     0   :  { %7 = vsyncpa [#allocation3], 0  ;;  %s230_s0 = inlined_call_operand.hbm [shape: f32[16,128], index: 0, kind: input, shape index: {}]   ;;  %s231_s1 = inlined_call_operand.hbm [shape: f32[16,128], index: 1, kind: input, shape index: {}]   ;;  %s232_s2 = inlined_call_operand.hbm [shape: f32[8,128], index: 2, kind: output, shape index: {}]  }
   0x1   :  { %8 = vsyncpa [#allocation6], 0 }
   0x2   :  { %9 = vsyncpa [#allocation4], 0  ;;  %s201_s9 = smov [#allocation2]  }
   0x3   :  { %s19_s10 = sshll.u32 %s201_s9, 4  ;;  %s20_s10 = int_to_ptr.vmem [resolvable:$true] %s19_s10 }
   0x4   :  { %s143_s11 = scalar_lea.vmem %s20_s10, 256  ;;  %p148_p1 = scmp.lt.s32.totalorder %s20_s10, %s20_s10 }
   0x5   :  { %p144_p0 = scmp.ne.s32.totalorder %s20_s10, %s143_s11  ;;  %p149_p2 = scmp.lt.s32.totalorder %s143_s11, %s143_s11 }
   0x7   :  { %p150_p3 = por %p149_p2, %p148_p1 }
   0x9   :  { %p151_p4 = pnand %p150_p3, %p144_p0 }
   0xb   :  { %154 = shalt.err (!%p151_p4)
}
   0xc   :  { %s202_s12 = smov 128   ;;  %s203_s13 = smov 8  }
   0xd   :  { %25 = dma.hbm_to_vmem [thread:$0]  %s230_s0, 256, %s20_s10, [#allocation3], %s202_s12, %s202_s12, %s203_s13  }
   0xe   :  { %s204_s16 = smov [#allocation5]  }
   0xf   :  { %s35_s17 = sshll.u32 %s204_s16, 4  ;;  %s36_s17 = int_to_ptr.vmem [resolvable:$true] %s35_s17 }
  0x10   :  { %s163_s18 = scalar_lea.vmem %s36_s17, 256  ;;  %p168_p6 = scmp.lt.s32.totalorder %s36_s17, %s36_s17 }
  0x11   :  { %p164_p5 = scmp.ne.s32.totalorder %s36_s17, %s163_s18  ;;  %p169_p7 = scmp.lt.s32.totalorder %s163_s18, %s163_s18 }
  0x13   :  { %p170_p8 = por %p169_p7, %p168_p6 }
  0x15   :  { %p171_p9 = pnand %p170_p8, %p164_p5 }
  0x17   :  { %174 = shalt.err (!%p171_p9)
}
  0x18   :  { %41 = dma.hbm_to_vmem [thread:$0]  %s231_s1, 256, %s36_s17, [#allocation6], %s202_s12, %s202_s12, %s203_s13  }
  0x19   :  { %195 = dma.done.wait [#allocation3], 256  }
  0x1a   :  { %196 = vsyncadd [#allocation3], 4294967040 }
  0x1b   :  { %197 = dma.done.wait [#allocation6], 256  }
  0x1c   :  { %198 = vsyncadd [#allocation6], 4294967040  ;;  %v57_v0 = vld [vmem:[#allocation2] sm:$0xff]  ;;  %v58_v1 = vld [vmem:[#allocation2 + $0x8] sm:$0xff]  ;;  %s205_s0 = smov [#allocation7]  }
  0x1d   :  { %123 = vlog2.f32 %v57_v0  ;;  %v67_v2 = vsub.f32 1.0, %v57_v0  ;;  %v68_v3 = vsub.f32 1.0, %v58_v1  ;;  %v59_v5 = vld [vmem:[#allocation5] sm:$0xff]  ;;  %v60_v7 = vld [vmem:[#allocation5 + $0x8] sm:$0xff]  ;;  %s107_s1 = sshll.u32 %s205_s0, 4  ;;  %s108_s1 = int_to_ptr.vmem [resolvable:$true] %s107_s1 }
  0x1e   :  { %125 = vlog2.f32 %v58_v1  ;;  %v77_v14 = vsub.f32 1.0, %v59_v5  ;;  %v78_v17 = vsub.f32 1.0, %v60_v7  ;;  %s175_s21 = scalar_lea.vmem %s108_s1, 128  ;;  %p180_p11 = scmp.lt.s32.totalorder %s108_s1, %s108_s1 }
  0x1f   :  { %127 = vlog2.f32 %v67_v2  ;;  %p176_p10 = scmp.ne.s32.totalorder %s108_s1, %s175_s21  ;;  %p181_p12 = scmp.lt.s32.totalorder %s175_s21, %s175_s21 }
  0x20   :  { %129 = vlog2.f32 %v68_v3 }
  0x21   :  { %p182_p13 = por %p181_p12, %p180_p11 }
  0x23   :  { %p183_p0 = pnand %p182_p13, %p176_p10 }
  0x2a   :  { %v124_v4 = vpop.eup %123 }
  0x2b   :  { %v126_v6 = vpop.eup %125  ;;  %v62_v8 = vmul.f32 0.6931472, %v124_v4 }
  0x2c   :  { %v128_v9 = vpop.eup %127  ;;  %v64_v10 = vmul.f32 0.6931472, %v126_v6 }
  0x2d   :  { %v130_v11 = vpop.eup %129  ;;  %v65_v12 = vmax.f32 %v62_v8, -100.0  ;;  %v70_v13 = vmul.f32 0.6931472, %v128_v9 }
  0x2e   :  { %v66_v15 = vmax.f32 %v64_v10, -100.0  ;;  %v72_v16 = vmul.f32 0.6931472, %v130_v11 }
  0x2f   :  { %v73_v18 = vmax.f32 %v70_v13, -100.0  ;;  %v75_v19 = vmul.f32 %v65_v12, %v59_v5 }
  0x30   :  { %v74_v20 = vmax.f32 %v72_v16, -100.0  ;;  %v76_v21 = vmul.f32 %v66_v15, %v60_v7 }
  0x31   :  { %v79_v22 = vmul.f32 %v77_v14, %v73_v18 }
  0x32   :  { %v80_v23 = vmul.f32 %v78_v17, %v74_v20 }
  0x33   :  { %v81_v24 = vadd.f32 %v79_v22, %v75_v19 }
  0x34   :  { %v82_v25 = vadd.f32 %v80_v23, %v76_v21 }
  0x35   :  { %v83_v26 = vsub.f32 0.0, %v81_v24 }
  0x36   :  { %v84_v27 = vsub.f32 0.0, %v82_v25 }
  0x37   :  { %v85_v28 = vsub.f32 0.0, %v83_v26 }
  0x38   :  { %v86_v29 = vsub.f32 0.0, %v84_v27 }
  0x39   :  { %v87_v30 = vmul.f32 1.442695, %v85_v28 }
  0x3a   :  { %v89_v31 = vmul.f32 1.442695, %v86_v29 }
  0x3b   :  { %131 = vpow2.f32 %v87_v30 }
  0x3c   :  { %133 = vpow2.f32 %v89_v31 }
  0x48   :  { %v132_v32 = vpop.eup %131 }
  0x49   :  { %v134_v33 = vpop.eup %133  ;;  %v91_v34 = vsub.f32 1.0, %v132_v32 }
  0x4a   :  { %v92_v35 = vsub.f32 1.0, %v134_v33 }
  0x4b   :  { %v93_v36 = vmul.f32 %v91_v34, %v91_v34 }
  0x4c   :  { %v94_v37 = vmul.f32 %v92_v35, %v92_v35 }
  0x4d   :  { %v95_v38 = vmul.f32 %v93_v36, %v83_v26 }
  0x4e   :  { %v96_v39 = vmul.f32 %v94_v37, %v84_v27 }
  0x50   :  { %v98_v40 = vadd.f32 %v96_v39, %v95_v38 }
  0x52   :  { %100 = vst [vmem:[#allocation7] sm:$0xff] %v98_v40 }
  0x53   :  { %186 = shalt.err (!%p183_p0)
}
  0x54   :  { %110 = dma.vmem_to_hbm [thread:$0]  %s108_s1, 128, %s232_s2, [#allocation4]  }
  0x55   :  { %199 = dma.done.wait [#allocation4], 128  }
  0x56   :  { %200 = vsyncadd [#allocation4], 4294967168 }
  0x57   :  { %114 = vsyncpa [#allocation3], 1 }
  0x58   :  { %115 = vsyncpa [#allocation6], 1 }
  0x59   :  { %116 = vsyncpa [#allocation4], 1 }

</bundles_post_ra>
